<compile_context>
chip_gen: v7x
topology: tpu7x:2x2x1
jax: 0.10.0
libtpu: 0.0.40
codegen_flags: <defaults>
</compile_context>

<pallas_src>
import jax
import jax.numpy as jnp
from jax import lax
from jax.experimental import pallas as pl
from jax.experimental.pallas import tpu as pltpu


# ----------------------------------------------------------------------------
# helpers
# ----------------------------------------------------------------------------
def _round_up(x, m):
    return ((x + m - 1) // m) * m


def _pick_tile(dim, cap, step):
    """Largest multiple of `step` <= cap that divides `dim` (dim % step == 0)."""
    t = min(dim, cap)
    t -= t % step
    t = max(t, step)
    while dim % t:
        t -= step
    return t


# ----------------------------------------------------------------------------
# Kernels
# ----------------------------------------------------------------------------
def _fused_whole_kernel(x_ref, wmu_ref, wphi_ref, epsw_ref, b_ref, o_ref):
    """Small-problem path: whole arrays in VMEM, single invocation."""
    w = wmu_ref[...] + jax.nn.softplus(wphi_ref[...]) * epsw_ref[...]
    # Contract last dim of x (M,K) with last dim of w (N,K): no w.T materialized.
    o_ref[...] = lax.dot_general(
        x_ref[...], w,
        dimension_numbers=(((1,), (1,)), ((), ())),
        preferred_element_type=jnp.float32,
    ) + b_ref[...]


def _fused_tiled_kernel(x_ref, wmu_ref, wphi_ref, epsw_ref, b_ref, o_ref):
    """Tiled path with in-kernel weight sampling; accumulates into o_ref."""
    k = pl.program_id(2)

    @pl.when(k == 0)
    def _():
        o_ref[...] = jnp.zeros_like(o_ref)

    w = wmu_ref[...] + jax.nn.softplus(wphi_ref[...]) * epsw_ref[...]
    o_ref[...] += lax.dot_general(
        x_ref[...], w,
        dimension_numbers=(((1,), (1,)), ((), ())),
        preferred_element_type=jnp.float32,
    )

    @pl.when(k == pl.num_programs(2) - 1)
    def _():
        o_ref[...] += b_ref[...]


def _matmul_bias_kernel(x_ref, w_ref, b_ref, o_ref):
    """Tiled path with a pre-sampled weight; accumulates into o_ref."""
    k = pl.program_id(2)

    @pl.when(k == 0)
    def _():
        o_ref[...] = jnp.zeros_like(o_ref)

    o_ref[...] += lax.dot_general(
        x_ref[...], w_ref[...],
        dimension_numbers=(((1,), (1,)), ((), ())),
        preferred_element_type=jnp.float32,
    )

    @pl.when(k == pl.num_programs(2) - 1)
    def _():
        o_ref[...] += b_ref[...]


# ----------------------------------------------------------------------------
# Wrapper
# ----------------------------------------------------------------------------
def netlayer_forward(x, weight_mu, weight_phi, bias_mu, bias_phi,
                     eps_w, eps_b, *, tile_cap=512,
                     small_path_bytes=4 * 1024 * 1024):
    f32 = jnp.float32
    x = x.astype(f32)
    weight_mu = weight_mu.astype(f32)
    weight_phi = weight_phi.astype(f32)
    eps_w = eps_w.astype(f32)

    B, in_f = x.shape
    out_f = weight_mu.shape[0]

    # Bias sample is O(out_f) work: do it in plain JAX (one (1, N) stream into
    # the kernel instead of three tiny DMA streams + per-tile softplus).
    bias = (bias_mu.reshape(1, out_f).astype(f32)
            + jax.nn.softplus(bias_phi.reshape(1, out_f).astype(f32))
            * eps_b.reshape(1, out_f).astype(f32))

    # Lane/sublane-dense shapes: K, N -> multiples of 128; M -> multiple of 8.
    M = _round_up(B, 8)
    K = _round_up(in_f, 128)
    N = _round_up(out_f, 128)

    def pad2(a, rows, cols):
        return jnp.pad(a, ((0, rows - a.shape[0]), (0, cols - a.shape[1])))

    xp   = pad2(x, M, K)
    wmu  = pad2(weight_mu, N, K)
    wphi = pad2(weight_phi, N, K)
    ew   = pad2(eps_w, N, K)          # zero eps => padded weight entries are 0
    bp   = pad2(bias, 1, N)

    vmem_limit = 32 * 1024 * 1024     # safe on v5e/v6e/v7x; covers 512 tiles

    # ---- Fast path: whole problem fits in VMEM -> single un-gridded call ----
    total_bytes = 4 * (M * K + 3 * N * K + N + M * N)
    if total_bytes <= small_path_bytes:
        out = pl.pallas_call(
            _fused_whole_kernel,
            out_shape=jax.ShapeDtypeStruct((M, N), f32),
            in_specs=[
                pl.BlockSpec((M, K), lambda: (0, 0)),   # x
                pl.BlockSpec((N, K), lambda: (0, 0)),   # weight_mu
                pl.BlockSpec((N, K), lambda: (0, 0)),   # weight_phi
                pl.BlockSpec((N, K), lambda: (0, 0)),   # eps_w
                pl.BlockSpec((1, N), lambda: (0, 0)),   # sampled bias
            ],
            out_specs=pl.BlockSpec((M, N), lambda: (0, 0)),
            compiler_params=pltpu.CompilerParams(
                vmem_limit_bytes=vmem_limit,
            ),
        )(xp, wmu, wphi, ew, bp)
        return out[:B, :out_f]

    # ---- Tiled path ----------------------------------------------------------
    tm = _pick_tile(M, tile_cap, 8)
    tn = _pick_tile(N, tile_cap, 128)
    tk = _pick_tile(K, tile_cap, 128)
    grid = (M // tm, N // tn, K // tk)

    x_spec = pl.BlockSpec((tm, tk), lambda i, j, k: (i, k))
    w_spec = pl.BlockSpec((tn, tk), lambda i, j, k: (j, k))
    b_spec = pl.BlockSpec((1, tn), lambda i, j, k: (0, j))
    o_spec = pl.BlockSpec((tm, tn), lambda i, j, k: (i, j))

    if grid[0] <= 2:
        # Few M tiles (the realistic regime for this layer): fuse sampling into
        # the matmul — ~3*N*K weight-side bytes vs ~5*N*K for the two-pass form.
        out = pl.pallas_call(
            _fused_tiled_kernel,
            out_shape=jax.ShapeDtypeStruct((M, N), f32),
            grid_spec=pltpu.PrefetchScalarGridSpec(
                num_scalar_prefetch=0,
                grid=grid,
                in_specs=[x_spec, w_spec, w_spec, w_spec, b_spec],
                out_specs=o_spec,
            ),
            compiler_params=pltpu.CompilerParams(
                dimension_semantics=("parallel", "parallel", "arbitrary"),
                vmem_limit_bytes=vmem_limit,
            ),
        )(xp, wmu, wphi, ew, bp)
    else:
        # Many M tiles: pre-sample the weight ONCE in plain JAX (XLA fuses this
        # elementwise op at HBM roofline) and stream only w into the matmul, so
        # the weight-side traffic does not scale with the number of M tiles.
        w = wmu + jax.nn.softplus(wphi) * ew
        out = pl.pallas_call(
            _matmul_bias_kernel,
            out_shape=jax.ShapeDtypeStruct((M, N), f32),
            grid_spec=pltpu.PrefetchScalarGridSpec(
                num_scalar_prefetch=0,
                grid=grid,
                in_specs=[x_spec, w_spec, b_spec],
                out_specs=o_spec,
            ),
            compiler_params=pltpu.CompilerParams(
                dimension_semantics=("parallel", "parallel", "arbitrary"),
                vmem_limit_bytes=vmem_limit,
            ),
        )(xp, w, bp)

    return out[:B, :out_f]


# ----------------------------------------------------------------------------
if __name__ == "__main__":
    key = jax.random.PRNGKey(0)
    k_x, k_wmu, k_bmu, k_ew, k_eb = jax.random.split(key, 5)

    batch = 6          # pads to 8 sublanes
    in_features = 40   # pads to 128 lanes
    out_features = 24  # pads to 128 lanes

    # Parameter init matching the module's __init__ (f32 on TPU):
    #   weight_mu ~ U(-0.1, 0.1); phi = log(exp(1e-4) - 1), computed with expm1
    #   to avoid catastrophic cancellation in f32.
    phi_init = jnp.log(jnp.expm1(jnp.float32(1e-4)))

    weight_mu = jax.random.uniform(k_wmu, (out_features, in_features),
                                   jnp.float32, -0.1, 0.1)
    weight_phi = jnp.full((out_features, in_features), phi_init, jnp.float32)
    bias_mu = jax.random.uniform(k_bmu, (1, out_features),
                                 jnp.float32, -0.1, 0.1)
    bias_phi = jnp.full((1, out_features), phi_init, jnp.float32)

    # rsample noise (deterministic, generated in plain JAX glue)
    eps_w = jax.random.normal(k_ew, (out_features, in_features), jnp.float32)
    eps_b = jax.random.normal(k_eb, (1, out_features), jnp.float32)

    x = jax.random.normal(k_x, (batch, in_features), jnp.float32)

    out = netlayer_forward(x, weight_mu, weight_phi, bias_mu, bias_phi,
                           eps_w, eps_b)
    out = jax.block_until_ready(out)

    # Pure-JAX reference (same math)
    w_ref = weight_mu + jax.nn.softplus(weight_phi) * eps_w
    b_ref = bias_mu + jax.nn.softplus(bias_phi) * eps_b
    ref = x @ w_ref.T + b_ref

    assert out.shape == (batch, out_features)
    assert jnp.allclose(out, ref, atol=2e-5, rtol=2e-5), (
        float(jnp.max(jnp.abs(out - ref))))

    # Also exercise the tiled fused path once (forces grid > 1 along K/N)
    out2 = netlayer_forward(x, weight_mu, weight_phi, bias_mu, bias_phi,
                            eps_w, eps_b, small_path_bytes=0)
    out2 = jax.block_until_ready(out2)
    assert jnp.allclose(out2, ref, atol=2e-5, rtol=2e-5), (
        float(jnp.max(jnp.abs(out2 - ref))))

    print("KERNEL_OK")
</pallas_src>

<mosaic_0001>
module attributes {stable_mosaic.version = 11 : i64} {
  func.func @_fused_whole_kernel(%arg0: memref<8x128xf32, #tpu.memory_space<vmem>>, %arg1: memref<128x128xf32, #tpu.memory_space<vmem>>, %arg2: memref<128x128xf32, #tpu.memory_space<vmem>>, %arg3: memref<128x128xf32, #tpu.memory_space<vmem>>, %arg4: memref<1x128xf32, #tpu.memory_space<vmem>>, %arg5: memref<8x128xf32, #tpu.memory_space<vmem>>) attributes {dimension_semantics = [], scalar_prefetch = 0 : i64, scratch_operands = 0 : i64, tpu.core_type = #tpu.core_type<tc>} {
    %c0 = arith.constant 0 : index
    %c0_0 = arith.constant 0 : index
    %0 = vector.load %arg1[%c0, %c0_0] : memref<128x128xf32, #tpu.memory_space<vmem>>, vector<128x128xf32>
    %c0_1 = arith.constant 0 : index
    %c0_2 = arith.constant 0 : index
    %1 = vector.load %arg2[%c0_1, %c0_2] : memref<128x128xf32, #tpu.memory_space<vmem>>, vector<128x128xf32>
    %cst = arith.constant 0.000000e+00 : f32
    %2 = vector.broadcast %cst : f32 to vector<128x128xf32>
    %3 = arith.maximumf %1, %2 : vector<128x128xf32>
    %4 = vector.broadcast %cst : f32 to vector<128x128xf32>
    %5 = arith.subf %1, %4 : vector<128x128xf32>
    %6 = arith.cmpf one, %5, %5 : vector<128x128xf32>
    %7 = vector.broadcast %cst : f32 to vector<128x128xf32>
    %8 = arith.addf %1, %7 : vector<128x128xf32>
    %9 = math.absf %5 : vector<128x128xf32>
    %cst_3 = arith.constant 0.000000e+00 : f32
    %10 = vector.broadcast %cst_3 : f32 to vector<128x128xf32>
    %11 = arith.subf %10, %9 : vector<128x128xf32>
    %12 = math.exp %11 : vector<128x128xf32>
    %13 = math.log1p %12 : vector<128x128xf32>
    %14 = arith.addf %3, %13 : vector<128x128xf32>
    %15 = arith.select %6, %8, %14 : vector<128x128xi1>, vector<128x128xf32>
    %c0_4 = arith.constant 0 : index
    %c0_5 = arith.constant 0 : index
    %16 = vector.load %arg3[%c0_4, %c0_5] : memref<128x128xf32, #tpu.memory_space<vmem>>, vector<128x128xf32>
    %17 = arith.mulf %15, %16 : vector<128x128xf32>
    %18 = arith.addf %0, %17 : vector<128x128xf32>
    %c0_6 = arith.constant 0 : index
    %c0_7 = arith.constant 0 : index
    %19 = vector.load %arg0[%c0_6, %c0_7] : memref<8x128xf32, #tpu.memory_space<vmem>>, vector<8x128xf32>
    %cst_8 = arith.constant dense<0.000000e+00> : vector<8x128xf32>
    %20 = tpu.matmul %19, %18, %cst_8 {dimension_numbers = #tpu.dot_dimension_numbers<[1], [1], [0], [0], [0, 0, 1, 0], [], []>} : vector<8x128xf32>, vector<128x128xf32>, vector<8x128xf32> -> vector<8x128xf32>
    %c0_9 = arith.constant 0 : index
    %c0_10 = arith.constant 0 : index
    %21 = vector.load %arg4[%c0_9, %c0_10] : memref<1x128xf32, #tpu.memory_space<vmem>>, vector<1x128xf32>
    %22 = vector.broadcast %21 : vector<1x128xf32> to vector<8x128xf32>
    %23 = arith.addf %20, %22 : vector<8x128xf32>
    %c0_11 = arith.constant 0 : index
    %c0_12 = arith.constant 0 : index
    %24 = vector.load %arg5[%c0_11, %c0_12] : memref<8x128xf32, #tpu.memory_space<vmem>>, vector<8x128xf32>
    tpu.vector_store %arg5[%c0_11, %c0_12], %23 {strides = array<i32>} : memref<8x128xf32, #tpu.memory_space<vmem>>, vector<8x128xf32>,
    return
  }
}

</mosaic_0001>

<bundles_post_ra>
// kernel: tpu_custom_call.1
= control target key start
LH: loop header
LB: loop body
LE: loop exit
PB: predicated region body
PF: predicated region fallthrough
CT: control target
= control target key end

     0   :  { %10 = vsyncpa [#allocation3], 0  ;;  %s1201_s0 = inlined_call_operand.hbm [shape: f32[8,128], index: 0, kind: input, shape index: {}]   ;;  %s1202_s1 = inlined_call_operand.hbm [shape: f32[128,128], index: 1, kind: input, shape index: {}]   ;;  %s1203_s2 = inlined_call_operand.hbm [shape: f32[128,128], index: 2, kind: input, shape index: {}]   ;;  %s1204_s3 = inlined_call_operand.hbm [shape: f32[128,128], index: 3, kind: input, shape index: {}]   ;;  %s1205_s4 = inlined_call_operand.vmem [shape: f32[1,128], index: 4, kind: input, shape index: {}]   ;;  %s1206_s5 = inlined_call_operand.hbm [shape: f32[8,128], index: 5, kind: output, shape index: {}]  }
   0x1   :  { %11 = vsyncpa [#allocation6], 0 }
   0x2   :  { %12 = vsyncpa [#allocation9], 0 }
   0x3   :  { %13 = vsyncpa [#allocation4], 0  ;;  %s807_s18 = smov [#allocation5]   ;;  %s689_s22 = scalar_lea.hbm %s1202_s1, 2048 }
   0x4   :  { %s29_s19 = sshll.u32 %s807_s18, 4  ;;  %p690_p0 = scmp.ne.s32.totalorder %s1202_s1, %s689_s22  ;;  %s30_s19 = int_to_ptr.vmem [resolvable:$true] %s29_s19 }
   0x5   :  { %p693_p1 = scmp.lt.u32.totalorder %s689_s22, %s1202_s1 }
   0x7   :  { %p695_p2 = pnand %p693_p1, %p690_p0 }
   0x9   :  { %698 = shalt.err (!%p695_p2)
}
   0xa   :  { %s699_s27 = scalar_lea.vmem %s30_s19, 2048  ;;  %p704_p4 = scmp.lt.s32.totalorder %s30_s19, %s30_s19 }
   0xb   :  { %p700_p3 = scmp.ne.s32.totalorder %s30_s19, %s699_s27  ;;  %p705_p5 = scmp.lt.s32.totalorder %s699_s27, %s699_s27 }
   0xd   :  { %p706_p6 = por %p705_p5, %p704_p4 }
   0xf   :  { %p707_p7 = pnand %p706_p6, %p700_p3 }
  0x11   :  { %710 = shalt.err (!%p707_p7)
}
  0x12   :  { %s808_s28 = smov 128   ;;  %s809_s29 = smov 8  }
  0x13   :  { %35 = dma.hbm_to_vmem [thread:$0]  %s1202_s1, 2048, %s30_s19, [#allocation6], %s808_s28, %s808_s28, %s809_s29  }
  0x14   :  { %s810_s7 = smov [#allocation2]   ;;  %s811_s9 = smov [#allocation7]  }
  0x15   :  { %s20_s8 = sshll.u32 %s810_s7, 4  ;;  %s41_s10 = sshll.u32 %s811_s9, 4  ;;  %s21_s8 = int_to_ptr.vmem [resolvable:$true] %s20_s8  ;;  %s42_s10 = int_to_ptr.vmem [resolvable:$true] %s41_s10 }
  0x16   :  { %s711_s13 = scalar_lea.hbm %s1201_s0, 128 }
  0x17   :  { %p712_p8 = scmp.ne.s32.totalorder %s1201_s0, %s711_s13  ;;  %p715_p9 = scmp.lt.u32.totalorder %s711_s13, %s1201_s0 }
  0x19   :  { %p717_p10 = pnand %p715_p9, %p712_p8 }
  0x1b   :  { %720 = shalt.err (!%p717_p10)
}
  0x1c   :  { %s721_s1 = scalar_lea.vmem %s21_s8, 128  ;;  %p726_p12 = scmp.lt.s32.totalorder %s21_s8, %s21_s8 }
  0x1d   :  { %p722_p11 = scmp.ne.s32.totalorder %s21_s8, %s721_s1  ;;  %p727_p13 = scmp.lt.s32.totalorder %s721_s1, %s721_s1 }
  0x1f   :  { %p728_p0 = por %p727_p13, %p726_p12 }
  0x21   :  { %p729_p1 = pnand %p728_p0, %p722_p11 }
  0x23   :  { %732 = shalt.err (!%p729_p1)
}
  0x24   :  { %23 = dma.hbm_to_vmem [thread:$0]  %s1201_s0, 128, %s21_s8, [#allocation3]  }
  0x25   :  { %s733_s22 = scalar_lea.hbm %s1203_s2, 2048 }
  0x26   :  { %p734_p2 = scmp.ne.s32.totalorder %s1203_s2, %s733_s22  ;;  %p737_p3 = scmp.lt.u32.totalorder %s733_s22, %s1203_s2 }
  0x28   :  { %p739_p4 = pnand %p737_p3, %p734_p2 }
  0x2a   :  { %742 = shalt.err (!%p739_p4)
}
  0x2b   :  { %s743_s27 = scalar_lea.vmem %s42_s10, 2048  ;;  %p748_p6 = scmp.lt.s32.totalorder %s42_s10, %s42_s10 }
  0x2c   :  { %p744_p5 = scmp.ne.s32.totalorder %s42_s10, %s743_s27  ;;  %p749_p7 = scmp.lt.s32.totalorder %s743_s27, %s743_s27 }
  0x2e   :  { %p750_p8 = por %p749_p7, %p748_p6 }
  0x30   :  { %p751_p9 = pnand %p750_p8, %p744_p5 }
  0x32   :  { %754 = shalt.err (!%p751_p9)
}
  0x33   :  { %47 = dma.hbm_to_vmem [thread:$0]  %s1203_s2, 2048, %s42_s10, [#allocation6], %s808_s28, %s808_s28, %s809_s29  }
  0x34   :  { %s812_s6 = smov [#allocation8]   ;;  %s755_s11 = scalar_lea.hbm %s1204_s3, 2048 }
  0x35   :  { %s53_s7 = sshll.u32 %s812_s6, 4  ;;  %p756_p10 = scmp.ne.s32.totalorder %s1204_s3, %s755_s11  ;;  %s54_s7 = int_to_ptr.vmem [resolvable:$true] %s53_s7 }
  0x36   :  { %p759_p11 = scmp.lt.u32.totalorder %s755_s11, %s1204_s3 }
  0x38   :  { %p761_p12 = pnand %p759_p11, %p756_p10 }
  0x3a   :  { %764 = shalt.err (!%p761_p12)
}
  0x3b   :  { %s765_s16 = scalar_lea.vmem %s54_s7, 2048  ;;  %p770_p0 = scmp.lt.s32.totalorder %s54_s7, %s54_s7 }
  0x3c   :  { %p766_p13 = scmp.ne.s32.totalorder %s54_s7, %s765_s16  ;;  %p771_p1 = scmp.lt.s32.totalorder %s765_s16, %s765_s16 }
  0x3e   :  { %p772_p2 = por %p771_p1, %p770_p0 }
  0x40   :  { %p773_p3 = pnand %p772_p2, %p766_p13 }
  0x42   :  { %776 = shalt.err (!%p773_p3)
}
  0x43   :  { %59 = dma.hbm_to_vmem [thread:$0]  %s1204_s3, 2048, %s54_s7, [#allocation9], %s808_s28, %s808_s28, %s809_s29  }
  0x44   :  { %799 = dma.done.wait [#allocation3], 128  }
  0x45   :  { %800 = vsyncadd [#allocation3], 4294967168 }
  0x46   :  { %801 = dma.done.wait [#allocation6], 4096  }
  0x47   :  { %802 = vsyncadd [#allocation6], 4294963200 }
  0x48   :  { %803 = dma.done.wait [#allocation9], 2048  }
  0x49   :  { %804 = vsyncadd [#allocation9], 4294965248  ;;  %v813_v0 = vmov 0.0|0.0   ;;  %vm814_vm0 = vmmov 0   ;;  %v815_v1 = vmov 0.0   ;;  %v905_v2 = vld [vmem:[#allocation7] sm:$0xff] }
  0x4a   :  { %591 = vmatprep.subr.bf16.mxu0 %v813_v0  ;;  %588 = vmatprep.mubr.msk.f32.mxu0 %vm814_vm0, %v815_v1  ;;  %v907_v3 = vld [vmem:[#allocation7 + $0x8] sm:$0xff]  ;;  %v154_v4 = vand.u32 2147483647, %v905_v2  ;;  %v911_v6 = vld [vmem:[#allocation7 + $0x10] sm:$0xff]  ;;  %v913_v8 = vld [vmem:[#allocation7 + $0x18] sm:$0xff]  ;;  %v106_v32 = vmax.f32 %v905_v2, 0.0  ;;  %vm122_vm3 = vcmp.ne.f32.partialorder %v905_v2, %v905_v2 }
  0x4b   :  { %v155_v5 = vand.u32 2147483647, %v907_v3  ;;  %v156_v9 = vand.u32 2147483647, %v911_v6  ;;  %v157_v11 = vand.u32 2147483647, %v913_v8  ;;  %vm123_vm5 = vcmp.ne.f32.partialorder %v907_v3, %v907_v3 }
  0x4c   :  { %v170_v7 = vsub.f32 0.0, %v154_v4  ;;  %v917_v14 = vld [vmem:[#allocation7 + $0x20] sm:$0xff]  ;;  %v919_v15 = vld [vmem:[#allocation7 + $0x28] sm:$0xff]  ;;  %v923_v22 = vld [vmem:[#allocation7 + $0x30] sm:$0xff]  ;;  %v107_v37 = vmax.f32 %v907_v3, 0.0  ;;  %v108_v38 = vmax.f32 %v911_v6, 0.0  ;;  %vm124_vm6 = vcmp.ne.f32.partialorder %v911_v6, %v911_v6 }
  0x4d   :  { %v171_v10 = vsub.f32 0.0, %v155_v5  ;;  %v172_v13 = vsub.f32 0.0, %v156_v9  ;;  %v173_v17 = vsub.f32 0.0, %v157_v11  ;;  %v158_v20 = vand.u32 2147483647, %v917_v14  ;;  %v925_v23 = vld [vmem:[#allocation7 + $0x38] sm:$0xff] }
  0x4e   :  { %v186_v12 = vmul.f32 1.442695, %v170_v7  ;;  %v159_v21 = vand.u32 2147483647, %v919_v15  ;;  %v160_v26 = vand.u32 2147483647, %v923_v22  ;;  %vm125_vm8 = vcmp.ne.f32.partialorder %v913_v8, %v913_v8 }
  0x4f   :  { %v188_v16 = vmul.f32 1.442695, %v171_v10  ;;  %v190_v18 = vmul.f32 1.442695, %v172_v13  ;;  %v192_v19 = vmul.f32 1.442695, %v173_v17  ;;  %vm126_vm11 = vcmp.ne.f32.partialorder %v917_v14, %v917_v14 }
  0x50   :  { %625 = vpow2.f32 %v186_v12  ;;  %v174_v24 = vsub.f32 0.0, %v158_v20  ;;  %v175_v25 = vsub.f32 0.0, %v159_v21  ;;  %v928_v27 = vld [vmem:[#allocation7 + $0x40] sm:$0xff]  ;;  %v930_v28 = vld [vmem:[#allocation7 + $0x48] sm:$0xff]  ;;  %v161_v31 = vand.u32 2147483647, %v925_v23 }
  0x51   :  { %627 = vpow2.f32 %v188_v16  ;;  %v176_v33 = vsub.f32 0.0, %v160_v26  ;;  %v162_v35 = vand.u32 2147483647, %v928_v27  ;;  %v163_v36 = vand.u32 2147483647, %v930_v28  ;;  %v943_v48 = vld [vmem:[#allocation7 + $0x50] sm:$0xff] }
  0x52   :  { %629 = vpow2.f32 %v190_v18  ;;  %v194_v29 = vmul.f32 1.442695, %v174_v24  ;;  %v196_v30 = vmul.f32 1.442695, %v175_v25  ;;  %v177_v34 = vsub.f32 0.0, %v161_v31  ;;  %v945_v53 = vld [vmem:[#allocation7 + $0x58] sm:$0xff] }
  0x53   :  { %631 = vpow2.f32 %v192_v19  ;;  %v198_v39 = vmul.f32 1.442695, %v176_v33  ;;  %v109_v40 = vmax.f32 %v913_v8, 0.0  ;;  %v110_v41 = vmax.f32 %v917_v14, 0.0  ;;  %s816_s29 = smov [#allocation10]  }
  0x54   :  { %633 = vpow2.f32 %v194_v29  ;;  %v111_v42 = vmax.f32 %v919_v15, 0.0  ;;  %v200_v43 = vmul.f32 1.442695, %v177_v34  ;;  %v112_v45 = vmax.f32 %v923_v22, 0.0  ;;  %s527_s17 = sshll.u32 %s816_s29, 4  ;;  %s528_s17 = int_to_ptr.vmem [resolvable:$true] %s527_s17 }
  0x55   :  { %635 = vpow2.f32 %v196_v30  ;;  %v113_v46 = vmax.f32 %v925_v23, 0.0  ;;  %v178_v47 = vsub.f32 0.0, %v162_v35  ;;  %v179_v52 = vsub.f32 0.0, %v163_v36  ;;  %s777_s1 = scalar_lea.vmem %s528_s17, 128  ;;  %p782_p5 = scmp.lt.s32.totalorder %s528_s17, %s528_s17 }
  0x56   :  { %637 = vpow2.f32 %v198_v39  ;;  %v164_v62 = vand.u32 2147483647, %v943_v48  ;;  %v165_v4 = vand.u32 2147483647, %v945_v53  ;;  %vm127_vm12 = vcmp.ne.f32.partialorder %v919_v15, %v919_v15  ;;  %p778_p4 = scmp.ne.s32.totalorder %s528_s17, %s777_s1  ;;  %p783_p6 = scmp.lt.s32.totalorder %s777_s1, %s777_s1 }
  0x57   :  { %639 = vpow2.f32 %v200_v43  ;;  %v202_v9 = vmul.f32 1.442695, %v178_v47  ;;  %v204_v26 = vmul.f32 1.442695, %v179_v52  ;;  %vm128_vm15 = vcmp.ne.f32.partialorder %v923_v22, %v923_v22 }
  0x58   :  { %v180_v39 = vsub.f32 0.0, %v164_v62  ;;  %vm129_vm0 = vcmp.ne.f32.partialorder %v925_v23, %v925_v23  ;;  %p784_p7 = por %p783_p6, %p782_p5 }
  0x5a   :  { %v626_v44 = vpop.eup %625  ;;  %p785_p8 = pnand %p784_p7, %p778_p4 }
  0x5b   :  { %v628_v49 = vpop.eup %627  ;;  %v218_v50 = vadd.f32 1.0, %v626_v44  ;;  %v221_v51 = vmul.f32 -0.5, %v626_v44  ;;  %v224_v55 = vand.u32 2147483647, %v626_v44 }
  0x5c   :  { %v630_v54 = vpop.eup %629  ;;  %v227_v56 = vadd.f32 1.0, %v628_v49  ;;  %v230_v57 = vmul.f32 -0.5, %v628_v49  ;;  %v233_v58 = vand.u32 2147483647, %v628_v49 }
  0x5d   :  { %v632_v59 = vpop.eup %631  ;;  %641 = vlog2.f32 %v218_v50  ;;  %v222_v60 = vadd.f32 1.0, %v221_v51  ;;  %v236_v61 = vadd.f32 1.0, %v630_v54  ;;  %v239_v1 = vmul.f32 -0.5, %v630_v54 }
  0x5e   :  { %643 = vlog2.f32 %v227_v56  ;;  %v231_v63 = vadd.f32 1.0, %v230_v57  ;;  %v242_v5 = vand.u32 2147483647, %v630_v54  ;;  %v245_v7 = vadd.f32 1.0, %v632_v59  ;;  %v634_v16 = vpop.eup %633 }
  0x5f   :  { %645 = vlog2.f32 %v236_v61  ;;  %vm949_vm1 = vcmp.lt.f32.partialorder %v224_v55, 0.0004427343  ;;  %vm953_vm2 = vcmp.lt.f32.partialorder %v233_v58, 0.0004427343  ;;  %v240_v12 = vadd.f32 1.0, %v239_v1  ;;  %v636_v20 = vpop.eup %635  ;;  %v398_v1 = vld [vmem:[#allocation8 + $0x20] sm:$0xff] }
  0x60   :  { %v248_v13 = vmul.f32 -0.5, %v632_v59  ;;  %v223_v17 = vmul.f32 %v626_v44, %v222_v60  ;;  %v232_v18 = vmul.f32 %v628_v49, %v231_v63  ;;  %647 = vlog2.f32 %v245_v7  ;;  %v638_v34 = vpop.eup %637  ;;  %v76_v44 = vld [vmem:[#allocation5 + $0x10] sm:$0xff] }
  0x61   :  { %v251_v19 = vand.u32 2147483647, %v632_v59  ;;  %vm959_vm4 = vcmp.lt.f32.partialorder %v242_v5, 0.0004427343  ;;  %v254_v25 = vadd.f32 1.0, %v634_v16  ;;  %v257_v29 = vmul.f32 -0.5, %v634_v16  ;;  %v967_v43 = vpop.eup %639 }
  0x62   :  { %v249_v24 = vadd.f32 1.0, %v248_v13  ;;  %v260_v30 = vand.u32 2147483647, %v634_v16  ;;  %v263_v31 = vadd.f32 1.0, %v636_v20  ;;  %v266_v33 = vmul.f32 -0.5, %v636_v20 }
  0x63   :  { %v241_v35 = vmul.f32 %v630_v54, %v240_v12  ;;  %649 = vlog2.f32 %v254_v25  ;;  %v269_v36 = vand.u32 2147483647, %v636_v20  ;;  %vm969_vm7 = vcmp.lt.f32.partialorder %v251_v19, 0.0004427343  ;;  %v394_v25 = vld [vmem:[#allocation8] sm:$0xff] }
  0x64   :  { %v258_v47 = vadd.f32 1.0, %v257_v29  ;;  %651 = vlog2.f32 %v263_v31  ;;  %v267_v49 = vadd.f32 1.0, %v266_v33  ;;  %v250_v50 = vmul.f32 %v632_v59, %v249_v24 }
  0x65   :  { %v272_v51 = vadd.f32 1.0, %v638_v34  ;;  %v275_v52 = vmul.f32 -0.5, %v638_v34  ;;  %v278_v55 = vand.u32 2147483647, %v638_v34  ;;  %vm975_vm9 = vcmp.lt.f32.partialorder %v260_v30, 0.0004427343 }
  0x66   :  { %v281_v57 = vadd.f32 1.0, %v967_v43  ;;  %v284_v58 = vmul.f32 -0.5, %v967_v43  ;;  %v181_v60 = vsub.f32 0.0, %v165_v4  ;;  %v259_v63 = vmul.f32 %v634_v16, %v258_v47  ;;  %v395_v30 = vld [vmem:[#allocation8 + $0x8] sm:$0xff] }
  0x67   :  { %v642_v54 = vpop.eup %641  ;;  %vm981_vm10 = vcmp.lt.f32.partialorder %v269_v36, 0.0004427343  ;;  %653 = vlog2.f32 %v272_v51  ;;  %v268_v7 = vmul.f32 %v636_v20, %v267_v49  ;;  %v276_v12 = vadd.f32 1.0, %v275_v52 }
  0x68   :  { %v644_v61 = vpop.eup %643  ;;  %v220_v62 = vmul.f32 0.6931472, %v642_v54  ;;  %655 = vlog2.f32 %v281_v57  ;;  %vm991_vm13 = vcmp.lt.f32.partialorder %v278_v55, 0.0004427343  ;;  %v285_v29 = vadd.f32 1.0, %v284_v58  ;;  %v397_v55 = vld [vmem:[#allocation8 + $0x18] sm:$0xff] }
  0x69   :  { %v646_v59 = vpop.eup %645  ;;  %v229_v5 = vmul.f32 0.6931472, %v644_v61  ;;  %657 = vpow2.f32 %v202_v9  ;;  %v287_v10 = vand.u32 2147483647, %v967_v43  ;;  %v74_v9 = vld [vmem:[#allocation5] sm:$0xff]  ;;  %v277_v51 = vmul.f32 %v638_v34, %v276_v12  ;;  %v77_v61 = vld [vmem:[#allocation5 + $0x18] sm:$0xff] }
  0x6a   :  { %v226_v13 = vsel %vm949_vm1, %v223_v17, %v220_v62  ;;  %v238_v4 = vmul.f32 0.6931472, %v646_v59  ;;  %v648_v19 = vpop.eup %647  ;;  %659 = vpow2.f32 %v204_v26  ;;  %v206_v36 = vmul.f32 1.442695, %v180_v39 }
  0x6b   :  { %v235_v24 = vsel %vm953_vm2, %v232_v18, %v229_v5  ;;  %v362_v20 = vadd.f32 %v226_v13, %v106_v32  ;;  %v247_v33 = vmul.f32 0.6931472, %v648_v19  ;;  %v396_v18 = vld [vmem:[#allocation8 + $0x10] sm:$0xff]  ;;  %v208_v47 = vmul.f32 1.442695, %v181_v60 }
  0x6c   :  { %v363_v17 = vadd.f32 %v235_v24, %v107_v37  ;;  %v244_v31 = vsel %vm959_vm4, %v241_v35, %v238_v4  ;;  %v75_v37 = vld [vmem:[#allocation5 + $0x8] sm:$0xff]  ;;  %661 = vpow2.f32 %v206_v36  ;;  %v286_v5 = vmul.f32 %v967_v43, %v285_v29 }
  0x6d   :  { %v378_v11 = vsel %vm122_vm3, %v905_v2, %v362_v20  ;;  %v364_v32 = vadd.f32 %v244_v31, %v108_v38  ;;  %v650_v49 = vpop.eup %649  ;;  %v253_v35 = vsel %vm969_vm7, %v250_v50, %v247_v33  ;;  %663 = vpow2.f32 %v208_v47  ;;  %v399_v43 = vld [vmem:[#allocation8 + $0x28] sm:$0xff]  ;;  %v401_v47 = vld [vmem:[#allocation8 + $0x38] sm:$0xff] }
  0x6e   :  { %v379_v21 = vsel %vm123_vm5, %v907_v3, %v363_v17  ;;  %v410_v26 = vmul.f32 %v394_v25, %v378_v11  ;;  %v652_v52 = vpop.eup %651  ;;  %v365_v38 = vadd.f32 %v253_v35, %v109_v40  ;;  %v256_v54 = vmul.f32 0.6931472, %v650_v49  ;;  %v79_v31 = vld [vmem:[#allocation5 + $0x28] sm:$0xff] }
  0x6f   :  { %v411_v2 = vmul.f32 %v395_v30, %v379_v21  ;;  %v380_v39 = vsel %vm124_vm6, %v911_v6, %v364_v32  ;;  %v265_v3 = vmul.f32 0.6931472, %v652_v52  ;;  %vm1035_vm14 = vcmp.lt.f32.partialorder %v287_v10, 0.0004427343  ;;  %v78_v30 = vld [vmem:[#allocation5 + $0x20] sm:$0xff] }
  0x70   :  { %v426_v57 = vadd.f32 %v410_v26, %v74_v9  ;;  %v412_v58 = vmul.f32 %v396_v18, %v380_v39  ;;  %v381_v34 = vsel %vm125_vm8, %v913_v8, %v365_v38  ;;  %v262_v40 = vsel %vm975_vm9, %v259_v63, %v256_v54  ;;  %v1081_v39 = vld [vmem:[#allocation7 + $0x60] sm:$0xff]  ;;  %v80_v54 = vld [vmem:[#allocation5 + $0x30] sm:$0xff] }
  0x71   :  { %v427_v60 = vadd.f32 %v411_v2, %v75_v37  ;;  %v654_v50 = vpop.eup %653  ;;  %v413_v6 = vmul.f32 %v397_v55, %v381_v34  ;;  %v271_v62 = vsel %vm981_vm10, %v268_v7, %v265_v3  ;;  %v366_v59 = vadd.f32 %v262_v40, %v110_v41  ;;  %v1083_v55 = vld [vmem:[#allocation7 + $0x68] sm:$0xff] }
  0x72   :  { %v656_v12 = vpop.eup %655  ;;  %v367_v8 = vadd.f32 %v271_v62, %v111_v42  ;;  %v274_v4 = vmul.f32 0.6931472, %v654_v50  ;;  %v428_v19 = vadd.f32 %v412_v58, %v76_v44  ;;  %v114_v26 = vmax.f32 %v928_v27, 0.0  ;;  %v1092_v50 = vld [vmem:[#allocation7 + $0x70] sm:$0xff] }
  0x73   :  { %v592_v13 = vpack.c.bf16 %v427_v60, %v426_v57  ;;  %v1039_v63 = vpop.eup %657  ;;  %v382_v41 = vsel %vm126_vm11, %v917_v14, %v366_v59  ;;  %v283_v7 = vmul.f32 0.6931472, %v656_v12  ;;  %v429_v24 = vadd.f32 %v413_v6, %v77_v61  ;;  %v81_v57 = vld [vmem:[#allocation5 + $0x38] sm:$0xff] }
  0x74   :  { %v383_v42 = vsel %vm127_vm12, %v919_v15, %v367_v8  ;;  %v280_v20 = vsel %vm991_vm13, %v277_v51, %v274_v4  ;;  %v290_v25 = vadd.f32 1.0, %v1039_v63  ;;  %v1052_v29 = vpop.eup %659  ;;  %v414_v16 = vmul.f32 %v398_v1, %v382_v41  ;;  %v1094_v61 = vld [vmem:[#allocation7 + $0x78] sm:$0xff] }
  0x75   :  { %593 = vmatpush3.bf16.xpose.msra.mxu0 %v592_v13  ;;  %v289_v14 = vsel %vm1035_vm14, %v286_v5, %v283_v7  ;;  %v368_v15 = vadd.f32 %v280_v20, %v112_v45  ;;  %v415_v10 = vmul.f32 %v399_v43, %v383_v42  ;;  %v293_v33 = vmul.f32 -0.5, %v1039_v63  ;;  %v400_v45 = vld [vmem:[#allocation8 + $0x30] sm:$0xff] }
  0x76   :  { %594 = vmatprep.subr.bf16.mxu0 %v813_v0  ;;  %v369_v17 = vadd.f32 %v289_v14, %v113_v46  ;;  %665 = vlog2.f32 %v290_v25  ;;  %v299_v9 = vadd.f32 1.0, %v1052_v29  ;;  %v595_v11 = vpack.c.bf16 %v429_v24, %v428_v19  ;;  %v1067_v32 = vpop.eup %661 }
  0x77   :  { %v384_v18 = vsel %vm128_vm15, %v923_v22, %v368_v15  ;;  %v1071_v49 = vpop.eup %663  ;;  %v430_v46 = vadd.f32 %v414_v16, %v78_v30  ;;  %v431_v37 = vadd.f32 %v415_v10, %v79_v31  ;;  %v302_v21 = vmul.f32 -0.5, %v1052_v29 }
  0x78   :  { %v385_v36 = vsel %vm129_vm0, %v925_v23, %v369_v17  ;;  %667 = vlog2.f32 %v299_v9  ;;  %vm130_vm1 = vcmp.ne.f32.partialorder %v928_v27, %v928_v27  ;;  %v294_v35 = vadd.f32 1.0, %v293_v33  ;;  %v402_v33 = vld [vmem:[#allocation8 + $0x40] sm:$0xff] }
  0x79   :  { %v296_v51 = vand.u32 2147483647, %v1039_v63  ;;  %v308_v22 = vadd.f32 1.0, %v1067_v32  ;;  %v416_v23 = vmul.f32 %v400_v45, %v384_v18  ;;  %v417_v52 = vmul.f32 %v401_v47, %v385_v36 }
  0x7a   :  { %v305_v2 = vand.u32 2147483647, %v1052_v29  ;;  %v317_v38 = vadd.f32 1.0, %v1071_v49  ;;  %v115_v58 = vmax.f32 %v930_v28, 0.0  ;;  %v116_v3 = vmax.f32 %v943_v48, 0.0 }
  0x7b   :  { %669 = vlog2.f32 %v308_v22  ;;  %v311_v60 = vmul.f32 -0.5, %v1067_v32  ;;  %v598_v44 = vpack.c.bf16 %v431_v37, %v430_v46  ;;  %vm131_vm2 = vcmp.ne.f32.partialorder %v930_v28, %v930_v28  ;;  %v403_v37 = vld [vmem:[#allocation8 + $0x48] sm:$0xff] }
  0x7c   :  { %v303_v34 = vadd.f32 1.0, %v302_v21  ;;  %671 = vlog2.f32 %v317_v38  ;;  %v320_v40 = vmul.f32 -0.5, %v1071_v49  ;;  %v295_v6 = vmul.f32 %v1039_v63, %v294_v35 }
  0x7d   :  { %596 = vmatpush3.bf16.xpose.msra.mxu0 %v595_v11  ;;  %vm1097_vm3 = vcmp.lt.f32.partialorder %v296_v51, 0.0004427343  ;;  %v166_v59 = vand.u32 2147483647, %v1081_v39  ;;  %v167_v5 = vand.u32 2147483647, %v1083_v55  ;;  %v432_v13 = vadd.f32 %v416_v23, %v80_v54 }
  0x7e   :  { %597 = vmatprep.subr.bf16.mxu0 %v813_v0  ;;  %v433_v8 = vadd.f32 %v417_v52, %v81_v57  ;;  %vm1103_vm4 = vcmp.lt.f32.partialorder %v305_v2, 0.0004427343  ;;  %v314_v56 = vand.u32 2147483647, %v1067_v32  ;;  %v312_v41 = vadd.f32 1.0, %v311_v60  ;;  %v83_v52 = vld [vmem:[#allocation5 + $0x48] sm:$0xff] }
  0x7f   :  { %v182_v63 = vsub.f32 0.0, %v166_v59  ;;  %v183_v1 = vsub.f32 0.0, %v167_v5  ;;  %v304_v43 = vmul.f32 %v1052_v29, %v303_v34  ;;  %v321_v7 = vadd.f32 1.0, %v320_v40  ;;  %v404_v40 = vld [vmem:[#allocation8 + $0x50] sm:$0xff]  ;;  %v406_v23 = vld [vmem:[#allocation8 + $0x60] sm:$0xff] }
  0x80   :  { %v666_v12 = vpop.eup %665  ;;  %v168_v24 = vand.u32 2147483647, %v1092_v50  ;;  %v169_v42 = vand.u32 2147483647, %v1094_v61  ;;  %v323_v14 = vand.u32 2147483647, %v1071_v49  ;;  %v601_v29 = vpack.c.bf16 %v433_v8, %v432_v13 }
  0x81   :  { %v292_v19 = vmul.f32 0.6931472, %v666_v12  ;;  %v210_v15 = vmul.f32 1.442695, %v182_v63  ;;  %v212_v16 = vmul.f32 1.442695, %v183_v1  ;;  %v313_v11 = vmul.f32 %v1067_v32, %v312_v41 }
  0x82   :  { %v668_v20 = vpop.eup %667  ;;  %v184_v30 = vsub.f32 0.0, %v168_v24  ;;  %v185_v31 = vsub.f32 0.0, %v169_v42  ;;  %v117_v9 = vmax.f32 %v945_v53, 0.0  ;;  %vm1123_vm5 = vcmp.lt.f32.partialorder %v314_v56, 0.0004427343  ;;  %v84_v56 = vld [vmem:[#allocation5 + $0x50] sm:$0xff] }
  0x83   :  { %v298_v25 = vsel %vm1097_vm3, %v295_v6, %v292_v19  ;;  %v301_v10 = vmul.f32 0.6931472, %v668_v20  ;;  %673 = vpow2.f32 %v210_v15  ;;  %v322_v32 = vmul.f32 %v1071_v49, %v321_v7  ;;  %v405_v6 = vld [vmem:[#allocation8 + $0x58] sm:$0xff] }
  0x84   :  { %v370_v17 = vadd.f32 %v298_v25, %v114_v26  ;;  %675 = vpow2.f32 %v212_v16  ;;  %v214_v45 = vmul.f32 1.442695, %v184_v30  ;;  %v216_v26 = vmul.f32 1.442695, %v185_v31 }
  0x85   :  { %599 = vmatpush3.bf16.xpose.msra.mxu0 %v598_v44  ;;  %v307_v18 = vsel %vm1103_vm4, %v304_v43, %v301_v10  ;;  %v670_v47 = vpop.eup %669  ;;  %vm1128_vm6 = vcmp.lt.f32.partialorder %v323_v14, 0.0004427343  ;;  %vm132_vm7 = vcmp.ne.f32.partialorder %v943_v48, %v943_v48  ;;  %vm133_vm8 = vcmp.ne.f32.partialorder %v945_v53, %v945_v53 }
  0x86   :  { %600 = vmatprep.subr.bf16.mxu0 %v813_v0  ;;  %v386_v36 = vsel %vm130_vm1, %v928_v27, %v370_v17  ;;  %v371_v46 = vadd.f32 %v307_v18, %v115_v58  ;;  %v672_v35 = vpop.eup %671  ;;  %v310_v22 = vmul.f32 0.6931472, %v670_v47  ;;  %677 = vpow2.f32 %v214_v45  ;;  %v82_v27 = vld [vmem:[#allocation5 + $0x40] sm:$0xff] }
  0x87   :  { %v418_v51 = vmul.f32 %v402_v33, %v386_v36  ;;  %v319_v38 = vmul.f32 0.6931472, %v672_v35  ;;  %679 = vpow2.f32 %v216_v26  ;;  %v118_v17 = vmax.f32 %v1081_v39, 0.0 }
  0x88   :  { %v387_v2 = vsel %vm131_vm2, %v930_v28, %v371_v46  ;;  %v316_v49 = vsel %vm1123_vm5, %v313_v11, %v310_v22  ;;  %v119_v30 = vmax.f32 %v1083_v55, 0.0  ;;  %vm134_vm11 = vcmp.ne.f32.partialorder %v1081_v39, %v1081_v39 }
  0x89   :  { %v419_v54 = vmul.f32 %v403_v37, %v387_v2  ;;  %v325_v57 = vsel %vm1128_vm6, %v322_v32, %v319_v38  ;;  %v372_v58 = vadd.f32 %v316_v49, %v116_v3  ;;  %v434_v28 = vadd.f32 %v418_v51, %v82_v27  ;;  %v85_v3 = vld [vmem:[#allocation5 + $0x58] sm:$0xff] }
  0x8a   :  { %v373_v44 = vadd.f32 %v325_v57, %v117_v9  ;;  %vm135_vm12 = vcmp.ne.f32.partialorder %v1083_v55, %v1083_v55  ;;  %v120_v32 = vmax.f32 %v1092_v50, 0.0  ;;  %v121_v49 = vmax.f32 %v1094_v61, 0.0 }
  0x8b   :  { %v435_v60 = vadd.f32 %v419_v54, %v83_v52  ;;  %v388_v34 = vsel %vm132_vm7, %v943_v48, %v372_v58  ;;  %v407_v54 = vld [vmem:[#allocation8 + $0x68] sm:$0xff]  ;;  %v86_v58 = vld [vmem:[#allocation5 + $0x60] sm:$0xff]  ;;  %vm136_vm15 = vcmp.ne.f32.partialorder %v1092_v50, %v1092_v50  ;;  %vm137_vm0 = vcmp.ne.f32.partialorder %v1094_v61, %v1094_v61 }
  0x8c   :  { %v389_v62 = vsel %vm133_vm8, %v945_v53, %v373_v44  ;;  %v420_v13 = vmul.f32 %v404_v40, %v388_v34  ;;  %v87_v44 = vld [vmem:[#allocation5 + $0x68] sm:$0xff] }
  0x8d   :  { %602 = vmatpush3.bf16.xpose.msra.mxu0 %v601_v29  ;;  %v674_v59 = vpop.eup %673  ;;  %v604_v12 = vpack.c.bf16 %v435_v60, %v434_v28  ;;  %v421_v8 = vmul.f32 %v405_v6, %v389_v62 }
  0x8e   :  { %603 = vmatprep.subr.bf16.mxu0 %v813_v0  ;;  %v676_v5 = vpop.eup %675  ;;  %v326_v4 = vadd.f32 1.0, %v674_v59  ;;  %v329_v1 = vmul.f32 -0.5, %v674_v59  ;;  %v436_v48 = vadd.f32 %v420_v13, %v84_v56  ;;  %v332_v14 = vand.u32 2147483647, %v674_v59  ;;  %v88_v56 = vld [vmem:[#allocation5 + $0x70] sm:$0xff] }
  0x8f   :  { %v335_v19 = vadd.f32 1.0, %v676_v5  ;;  %v437_v43 = vadd.f32 %v421_v8, %v85_v3  ;;  %v338_v7 = vmul.f32 -0.5, %v676_v5  ;;  %v341_v10 = vand.u32 2147483647, %v676_v5  ;;  %v409_v8 = vld [vmem:[#allocation8 + $0x78] sm:$0xff] }
  0x90   :  { %v678_v41 = vpop.eup %677  ;;  %681 = vlog2.f32 %v326_v4  ;;  %v330_v42 = vadd.f32 1.0, %v329_v1  ;;  %vm1152_vm9 = vcmp.lt.f32.partialorder %v332_v14, 0.0004427343  ;;  %v89_v3 = vld [vmem:[#allocation5 + $0x78] sm:$0xff] }
  0x91   :  { %v680_v63 = vpop.eup %679  ;;  %683 = vlog2.f32 %v335_v19  ;;  %v344_v24 = vadd.f32 1.0, %v678_v41  ;;  %v347_v20 = vmul.f32 -0.5, %v678_v41  ;;  %v607_v25 = vpack.c.bf16 %v437_v43, %v436_v48 }
  0x92   :  { %v353_v53 = vadd.f32 1.0, %v680_v63  ;;  %v339_v15 = vadd.f32 1.0, %v338_v7  ;;  %v356_v16 = vmul.f32 -0.5, %v680_v63  ;;  %v331_v31 = vmul.f32 %v674_v59, %v330_v42 }
  0x93   :  { %685 = vlog2.f32 %v344_v24  ;;  %v348_v29 = vadd.f32 1.0, %v347_v20  ;;  %v350_v18 = vand.u32 2147483647, %v678_v41  ;;  %vm342_vm10 = vcmp.lt.f32.partialorder %v341_v10, 0.0004427343  ;;  %v442_v24 = vld [vmem:[#allocation2] sm:$0xff] }
  0x94   :  { %687 = vlog2.f32 %v353_v53  ;;  %v340_v11 = vmul.f32 %v676_v5, %v339_v15  ;;  %v357_v36 = vadd.f32 1.0, %v356_v16  ;;  %v359_v46 = vand.u32 2147483647, %v680_v63  ;;  %v408_v5 = vld [vmem:[#allocation8 + $0x70] sm:$0xff] }
  0x95   :  { %605 = vmatpush3.bf16.xpose.msra.mxu0 %v604_v12  ;;  %v349_v26 = vmul.f32 %v678_v41, %v348_v29  ;;  %vm1164_vm13 = vcmp.lt.f32.partialorder %v350_v18, 0.0004427343 }
  0x96   :  { %606 = vmatprep.subr.bf16.mxu0 %v813_v0  ;;  %v358_v52 = vmul.f32 %v680_v63, %v357_v36  ;;  %vm360_vm14 = vcmp.lt.f32.partialorder %v359_v46, 0.0004427343 }
  0x9a   :  { %v682_v33 = vpop.eup %681 }
  0x9b   :  { %v684_v45 = vpop.eup %683  ;;  %v328_v47 = vmul.f32 0.6931472, %v682_v33 }
  0x9c   :  { %v337_v37 = vmul.f32 0.6931472, %v684_v45 }
  0x9d   :  { %608 = vmatpush3.bf16.xpose.msra.mxu0 %v607_v25  ;;  %v334_v21 = vsel %vm1152_vm9, %v331_v31, %v328_v47  ;;  %v686_v35 = vpop.eup %685 }
  0x9e   :  { %609 = vmatprep.subr.bf16.mxu0 %v813_v0  ;;  %v343_v51 = vsel %vm342_vm10, %v340_v11, %v337_v37  ;;  %v374_v22 = vadd.f32 %v334_v21, %v118_v17  ;;  %v688_v2 = vpop.eup %687  ;;  %v346_v57 = vmul.f32 0.6931472, %v686_v35 }
  0x9f   :  { %v375_v38 = vadd.f32 %v343_v51, %v119_v30  ;;  %v355_v60 = vmul.f32 0.6931472, %v688_v2 }
  0xa0   :  { %v390_v28 = vsel %vm134_vm11, %v1081_v39, %v374_v22  ;;  %v352_v6 = vsel %vm1164_vm13, %v349_v26, %v346_v57 }
  0xa1   :  { %v391_v34 = vsel %vm135_vm12, %v1083_v55, %v375_v38  ;;  %v422_v40 = vmul.f32 %v406_v23, %v390_v28  ;;  %v361_v59 = vsel %vm360_vm14, %v358_v52, %v355_v60  ;;  %v376_v39 = vadd.f32 %v352_v6, %v120_v32 }
  0xa2   :  { %v423_v62 = vmul.f32 %v407_v54, %v391_v34  ;;  %v377_v13 = vadd.f32 %v361_v59, %v121_v49 }
  0xa3   :  { %v438_v12 = vadd.f32 %v422_v40, %v86_v58  ;;  %v392_v55 = vsel %vm136_vm15, %v1092_v50, %v376_v39  ;;  %v538_v50 = vld [vmem:[%s1205_s4] ss:$0 sm:$0xff] }
  0xa4   :  { %v439_v4 = vadd.f32 %v423_v62, %v87_v44  ;;  %v393_v19 = vsel %vm137_vm0, %v1094_v61, %v377_v13  ;;  %v424_v41 = vmul.f32 %v408_v5, %v392_v55 }
  0xa5   :  { %v425_v1 = vmul.f32 %v409_v8, %v393_v19 }
  0xa6   :  { %v610_v63 = vpack.c.bf16 %v439_v4, %v438_v12  ;;  %v440_v48 = vadd.f32 %v424_v41, %v88_v56 }
  0xa7   :  { %v441_v43 = vadd.f32 %v425_v1, %v89_v3 }
  0xa8   :  { %611 = vmatpush3.bf16.xpose.msra.mxu0 %v610_v63 }
  0xa9   :  { %612 = vmatprep.subr.bf16.mxu0 %v813_v0  ;;  %v613_v7 = vpack.c.bf16 %v441_v43, %v440_v48 }
  0xb0   :  { %614 = vmatpush3.bf16.xpose.msra.mxu0 %v613_v7 }
  0xb7   :  { %589 = vmatmul.mubr.f32.vlgmr.msra.gmra.mrb[0].mxu0 %v442_v24 }
 0x18a   :  { %v516_v53 = vpop.f32.mrb[0].mxu0 }
 0x18b   :  { %v517_v61 = vadd.f32 %v538_v50, %v516_v53  ;;  %v590_v42 = vpop.f32.mrb[1].mxu0 }
 0x18d   :  { %520 = vst [vmem:[#allocation10] sm:$0xff] %v517_v61 }
 0x18e   :  { %788 = shalt.err (!%p785_p8)
}
 0x18f   :  { %s789_s20 = scalar_lea.hbm %s1206_s5, 128 }
 0x190   :  { %p790_p9 = scmp.ne.s32.totalorder %s1206_s5, %s789_s20  ;;  %p793_p10 = scmp.lt.u32.totalorder %s789_s20, %s1206_s5 }
 0x192   :  { %p795_p11 = pnand %p793_p10, %p790_p9 }
 0x194   :  { %798 = shalt.err (!%p795_p11)
}
 0x195   :  { %530 = dma.vmem_to_hbm [thread:$0]  %s528_s17, 128, %s1206_s5, [#allocation4]  }
 0x196   :  { %805 = dma.done.wait [#allocation4], 128  }
 0x197   :  { %806 = vsyncadd [#allocation4], 4294967168 }
 0x198   :  { %534 = vsyncpa [#allocation3], 1 }
 0x199   :  { %535 = vsyncpa [#allocation6], 1 }
 0x19a   :  { %536 = vsyncpa [#allocation9], 1 }
 0x19b   :  { %537 = vsyncpa [#allocation4], 1 }

</bundles_post_ra>
